<compile_context>
chip_gen: v5e
topology: v5e:2x2
jax: 0.10.0
libtpu: 0.0.40
codegen_flags: <defaults>
</compile_context>

<pallas_src>
from functools import partial

import jax
import jax.numpy as jnp
from jax.experimental import pallas as pl
from jax.experimental.pallas import tpu as pltpu


def mlp_kernel(xt_ref, w1t_ref, b1_ref, w2t_ref, b2_ref, w3t_ref, b3_ref, ot_ref):
    # xt_ref : (in_dim, TB)      batch on the lane axis
    # w1t_ref: (H, in_dim)   b1_ref: (H, 1)
    # w2t_ref: (H, H)        b2_ref: (H, 1)
    # w3t_ref: (O, H)        b3_ref: (O, 1)
    # ot_ref : (O, TB)
    xt = xt_ref[...]
    w1t = w1t_ref[...]
    in_dim = xt.shape[0]

    # ---- layer 1 on the VPU (K = in_dim is tiny; MXU would be ~98% padding).
    # Bias folded into the accumulator init: saves one full (H, TB) VALU pass.
    acc = w1t[:, 0:1] * xt[0:1, :] + b1_ref[...]        # (H, TB)
    for k in range(1, in_dim):                           # static unrolled loop
        acc = acc + w1t[:, k : k + 1] * xt[k : k + 1, :]
    h1 = jnp.maximum(acc, 0.0)                           # (H, TB)

    # ---- layer 2 on the MXU: h2 = relu(W2^T h1 + b2)
    h2 = jnp.dot(
        w2t_ref[...], h1,
        preferred_element_type=jnp.float32,
        precision=jax.lax.Precision.HIGHEST,
    )
    h2 = jnp.maximum(h2 + b2_ref[...], 0.0)              # (H, TB)

    # ---- output layer: logits = W3^T h2 + b3
    logits = jnp.dot(
        w3t_ref[...], h2,
        preferred_element_type=jnp.float32,
        precision=jax.lax.Precision.HIGHEST,
    ) + b3_ref[...]                                       # (O, TB)

    # ---- log_softmax over the class axis (axis 0 in transposed layout),
    # kept to the minimal set of (O, TB) temporaries.
    m = jnp.max(logits, axis=0, keepdims=True)            # (1, TB)
    shifted = logits - m
    lse = jnp.log(jnp.sum(jnp.exp(shifted), axis=0, keepdims=True))
    ot_ref[...] = (shifted - lse).astype(ot_ref.dtype)


def _round_up(n, m):
    return ((n + m - 1) // m) * m


@partial(jax.jit, static_argnames=("block_batch", "transposed_output"))
def classifier_mlp_forward(x, params, block_batch=16384, transposed_output=False):
    """x: (batch, in_dim) f32 -> (batch, out_dim) f32 log-probabilities.

    If transposed_output=True, returns the (out_dim, batch) layout instead,
    skipping the final transpose copy (use when the consumer can handle it).
    """
    w1, b1, w2, b2, w3, b3 = params
    batch, in_dim = x.shape
    hidden_dim = w1.shape[1]
    out_dim = w3.shape[1]

    # Pad only up to the 128-lane boundary (<=127 rows) -- NOT to a multiple of
    # the tile.  The grid uses cdiv with a ragged last tile.
    padded = _round_up(batch, 128)

    # Tile size: multiple of 128 lanes, capped so (a) the per-step working set
    # (~768 * tb bytes) fits comfortably in VMEM on every generation and
    # (b) the grid has >= 2 steps so v7x's two TensorCores both get work.
    tb = _round_up(min(block_batch, padded), 128)
    tb = min(tb, 32768)                                    # ~24 MiB working set
    if padded >= 256:
        tb = min(tb, _round_up(pl.cdiv(padded, 2), 128))   # >= 2 grid steps
    grid = (pl.cdiv(padded, tb),)

    # Scoped-VMEM limit from a conservative footprint estimate (double-buffered
    # x/out blocks + streamed (H, TB) intermediates), clamped to [32, 48] MiB.
    vmem_limit = max(32 << 20, min(int(896 * tb * 2), 48 << 20))

    # Layout plumbing (one fused pad+transpose copy): batch -> lane axis.
    x_t = jnp.pad(x, ((0, padded - batch), (0, 0))).T      # (in_dim, padded)
    w1t, b1c = w1.T, b1.T                                  # (H, in_dim), (H, 1)
    w2t, b2c = w2.T, b2.T                                  # (H, H),     (H, 1)
    w3t, b3c = w3.T, b3.T                                  # (O, H),     (O, 1)

    const = lambda shape: pl.BlockSpec(shape, lambda i: (0, 0))

    out_t = pl.pallas_call(
        mlp_kernel,
        out_shape=jax.ShapeDtypeStruct((out_dim, padded), jnp.float32),
        grid=grid,
        in_specs=[
            pl.BlockSpec((in_dim, tb), lambda i: (0, i)),   # x tile (pipelined)
            const((hidden_dim, in_dim)),                    # W1^T   (resident)
            const((hidden_dim, 1)),                         # b1
            const((hidden_dim, hidden_dim)),                # W2^T
            const((hidden_dim, 1)),                         # b2
            const((out_dim, hidden_dim)),                   # W3^T
            const((out_dim, 1)),                            # b3
        ],
        out_specs=pl.BlockSpec((out_dim, tb), lambda i: (0, i)),
        compiler_params=pltpu.CompilerParams(
            dimension_semantics=("parallel",),              # megacore on v7x
            vmem_limit_bytes=vmem_limit,
        ),
    )(x_t, w1t, b1c, w2t, b2c, w3t, b3c)

    if transposed_output:
        return out_t[:, :batch]      # (out_dim, batch): no transpose copy
    return out_t.T[:batch]           # standard (batch, out_dim)


def init_params(key, in_dim, hidden_dim, out_dim):
    """Deterministic init mimicking nn.Linear's uniform(-1/sqrt(fan_in), ...)."""
    ks = jax.random.split(key, 6)

    def linear(kw, kb, fan_in, fan_out):
        bound = 1.0 / jnp.sqrt(jnp.float32(fan_in))
        w = jax.random.uniform(kw, (fan_in, fan_out), jnp.float32, -bound, bound)
        b = jax.random.uniform(kb, (1, fan_out), jnp.float32, -bound, bound)
        return w, b

    w1, b1 = linear(ks[0], ks[1], in_dim, hidden_dim)
    w2, b2 = linear(ks[2], ks[3], hidden_dim, hidden_dim)
    w3, b3 = linear(ks[4], ks[5], hidden_dim, out_dim)
    return (w1, b1, w2, b2, w3, b3)


def reference_forward(x, params):
    w1, b1, w2, b2, w3, b3 = params
    h1 = jnp.maximum(x @ w1 + b1, 0.0)
    h2 = jnp.maximum(h1 @ w2 + b2, 0.0)
    logits = h2 @ w3 + b3
    return jax.nn.log_softmax(logits, axis=-1)


if __name__ == "__main__":
    # The module is fed x.reshape(-1, 2) -> in_dim = 2.
    in_dim, hidden_dim, out_dim = 2, 32, 4
    batch = 1000  # not a multiple of 128: exercises the ragged last tile

    key = jax.random.PRNGKey(0)
    kx, kp = jax.random.split(key)
    x = jax.random.normal(kx, (batch, in_dim), jnp.float32)
    params = init_params(kp, in_dim, hidden_dim, out_dim)

    ref = reference_forward(x, params)

    # Small block so the demo exercises a multi-step grid (1000 -> pad 1024,
    # tb=256, 4 grid steps).  Production callers should use the default
    # block_batch=16384 (and transposed_output=True when the consumer allows).
    out = classifier_mlp_forward(x, params, block_batch=256)
    out = jax.block_until_ready(out)
    assert out.shape == (batch, out_dim)
    assert jnp.allclose(out, ref, atol=1e-5, rtol=1e-5), "mismatch vs JAX reference"

    # Also exercise the default large-tile path and the transposed-output path.
    out_t = classifier_mlp_forward(x, params, transposed_output=True)
    out_t = jax.block_until_ready(out_t)
    assert out_t.shape == (out_dim, batch)
    assert jnp.allclose(out_t.T, ref, atol=1e-5, rtol=1e-5), "mismatch (transposed path)"

    print("KERNEL_OK")
</pallas_src>

<mosaic_0001>
module attributes {stable_mosaic.version = 11 : i64} {
  func.func @mlp_kernel(%arg0: i32, %arg1: memref<2x256xf32, #tpu.memory_space<vmem>>, %arg2: memref<32x2xf32, #tpu.memory_space<vmem>>, %arg3: memref<32x1xf32, #tpu.memory_space<vmem>>, %arg4: memref<32x32xf32, #tpu.memory_space<vmem>>, %arg5: memref<32x1xf32, #tpu.memory_space<vmem>>, %arg6: memref<4x32xf32, #tpu.memory_space<vmem>>, %arg7: memref<4x1xf32, #tpu.memory_space<vmem>>, %arg8: memref<4x256xf32, #tpu.memory_space<vmem>>) attributes {dimension_semantics = [#tpu.dimension_semantics<parallel>], iteration_bounds = array<i64: 4>, scalar_prefetch = 0 : i64, scratch_operands = 0 : i64, tpu.core_type = #tpu.core_type<tc>, window_params = [{transform_indices = @transform_0, window_bounds = array<i64: 2, 256>}, {pipeline_mode = #tpu.pipeline_mode<synchronous>, transform_indices = @transform_1, window_bounds = array<i64: 32, 2>}, {pipeline_mode = #tpu.pipeline_mode<synchronous>, transform_indices = @transform_2, window_bounds = array<i64: 32, 1>}, {pipeline_mode = #tpu.pipeline_mode<synchronous>, transform_indices = @transform_3, window_bounds = array<i64: 32, 32>}, {pipeline_mode = #tpu.pipeline_mode<synchronous>, transform_indices = @transform_4, window_bounds = array<i64: 32, 1>}, {pipeline_mode = #tpu.pipeline_mode<synchronous>, transform_indices = @transform_5, window_bounds = array<i64: 4, 32>}, {pipeline_mode = #tpu.pipeline_mode<synchronous>, transform_indices = @transform_6, window_bounds = array<i64: 4, 1>}, {transform_indices = @transform_7, window_bounds = array<i64: 4, 256>}]} {
    %c0 = arith.constant 0 : index
    %c0_0 = arith.constant 0 : index
    %0 = vector.load %arg1[%c0, %c0_0] : memref<2x256xf32, #tpu.memory_space<vmem>>, vector<2x256xf32>
    %c0_1 = arith.constant 0 : index
    %c0_2 = arith.constant 0 : index
    %1 = vector.load %arg2[%c0_1, %c0_2] : memref<32x2xf32, #tpu.memory_space<vmem>>, vector<32x2xf32>
    %2 = vector.extract_strided_slice %1 {offsets = [0, 0], sizes = [32, 1], strides = [1, 1]} : vector<32x2xf32> to vector<32x1xf32>
    %3 = vector.extract_strided_slice %0 {offsets = [0, 0], sizes = [1, 256], strides = [1, 1]} : vector<2x256xf32> to vector<1x256xf32>
    %4 = vector.broadcast %2 : vector<32x1xf32> to vector<32x256xf32>
    %5 = vector.broadcast %3 : vector<1x256xf32> to vector<32x256xf32>
    %6 = arith.mulf %4, %5 : vector<32x256xf32>
    %c0_3 = arith.constant 0 : index
    %c0_4 = arith.constant 0 : index
    %7 = vector.load %arg3[%c0_3, %c0_4] : memref<32x1xf32, #tpu.memory_space<vmem>>, vector<32x1xf32>
    %8 = vector.broadcast %7 : vector<32x1xf32> to vector<32x256xf32>
    %9 = arith.addf %6, %8 : vector<32x256xf32>
    %10 = vector.extract_strided_slice %1 {offsets = [0, 1], sizes = [32, 1], strides = [1, 1]} : vector<32x2xf32> to vector<32x1xf32>
    %11 = vector.extract_strided_slice %0 {offsets = [1, 0], sizes = [1, 256], strides = [1, 1]} : vector<2x256xf32> to vector<1x256xf32>
    %12 = vector.broadcast %10 : vector<32x1xf32> to vector<32x256xf32>
    %13 = vector.broadcast %11 : vector<1x256xf32> to vector<32x256xf32>
    %14 = arith.mulf %12, %13 : vector<32x256xf32>
    %15 = arith.addf %9, %14 : vector<32x256xf32>
    %cst = arith.constant 0.000000e+00 : f32
    %16 = vector.broadcast %cst : f32 to vector<32x256xf32>
    %17 = arith.maximumf %15, %16 : vector<32x256xf32>
    %c0_5 = arith.constant 0 : index
    %c0_6 = arith.constant 0 : index
    %18 = vector.load %arg4[%c0_5, %c0_6] : memref<32x32xf32, #tpu.memory_space<vmem>>, vector<32x32xf32>
    %cst_7 = arith.constant dense<0.000000e+00> : vector<32x256xf32>
    %19 = tpu.matmul %18, %17, %cst_7 {dimension_numbers = #tpu.dot_dimension_numbers<[1], [0], [0], [1], [0, 0, 1, 1], [], []>, precision = #tpu.contract_precision<fp32>} : vector<32x32xf32>, vector<32x256xf32>, vector<32x256xf32> -> vector<32x256xf32>
    %c0_8 = arith.constant 0 : index
    %c0_9 = arith.constant 0 : index
    %20 = vector.load %arg5[%c0_8, %c0_9] : memref<32x1xf32, #tpu.memory_space<vmem>>, vector<32x1xf32>
    %21 = vector.broadcast %20 : vector<32x1xf32> to vector<32x256xf32>
    %22 = arith.addf %19, %21 : vector<32x256xf32>
    %cst_10 = arith.constant 0.000000e+00 : f32
    %23 = vector.broadcast %cst_10 : f32 to vector<32x256xf32>
    %24 = arith.maximumf %22, %23 : vector<32x256xf32>
    %c0_11 = arith.constant 0 : index
    %c0_12 = arith.constant 0 : index
    %25 = vector.load %arg6[%c0_11, %c0_12] : memref<4x32xf32, #tpu.memory_space<vmem>>, vector<4x32xf32>
    %cst_13 = arith.constant dense<0.000000e+00> : vector<4x256xf32>
    %26 = tpu.matmul %25, %24, %cst_13 {dimension_numbers = #tpu.dot_dimension_numbers<[1], [0], [0], [1], [0, 0, 1, 1], [], []>, precision = #tpu.contract_precision<fp32>} : vector<4x32xf32>, vector<32x256xf32>, vector<4x256xf32> -> vector<4x256xf32>
    %c0_14 = arith.constant 0 : index
    %c0_15 = arith.constant 0 : index
    %27 = vector.load %arg7[%c0_14, %c0_15] : memref<4x1xf32, #tpu.memory_space<vmem>>, vector<4x1xf32>
    %28 = vector.broadcast %27 : vector<4x1xf32> to vector<4x256xf32>
    %29 = arith.addf %26, %28 : vector<4x256xf32>
    %cst_16 = arith.constant dense<0xFF800000> : vector<256xf32>
    %30 = vector.multi_reduction <maximumf>, %29, %cst_16 [0] : vector<4x256xf32> to vector<256xf32>
    %31 = vector.shape_cast %30 : vector<256xf32> to vector<1x256xf32>
    %32 = vector.broadcast %31 : vector<1x256xf32> to vector<4x256xf32>
    %33 = arith.subf %29, %32 : vector<4x256xf32>
    %34 = math.exp %33 : vector<4x256xf32>
    %cst_17 = arith.constant dense<0.000000e+00> : vector<256xf32>
    %35 = vector.multi_reduction <add>, %34, %cst_17 [0] : vector<4x256xf32> to vector<256xf32>
    %36 = vector.shape_cast %35 : vector<256xf32> to vector<1x256xf32>
    %37 = math.log %36 : vector<1x256xf32>
    %38 = vector.broadcast %37 : vector<1x256xf32> to vector<4x256xf32>
    %39 = arith.subf %33, %38 : vector<4x256xf32>
    %c0_18 = arith.constant 0 : index
    %c0_19 = arith.constant 0 : index
    %40 = vector.load %arg8[%c0_18, %c0_19] : memref<4x256xf32, #tpu.memory_space<vmem>>, vector<4x256xf32>
    tpu.vector_store %arg8[%c0_18, %c0_19], %39 {strides = array<i32>} : memref<4x256xf32, #tpu.memory_space<vmem>>, vector<4x256xf32>,
    return
  }
  func.func @transform_0(%arg0: i32) -> (i32, i32) {
    %c0_i32 = arith.constant 0 : i32
    %c0_i32_0 = arith.constant 0 : i32
    return %c0_i32, %arg0 : i32, i32
  }
  func.func @transform_1(%arg0: i32) -> (i32, i32) {
    %c0_i32 = arith.constant 0 : i32
    %c0_i32_0 = arith.constant 0 : i32
    %c0_i32_1 = arith.constant 0 : i32
    return %c0_i32, %c0_i32_0 : i32, i32
  }
  func.func @transform_2(%arg0: i32) -> (i32, i32) {
    %c0_i32 = arith.constant 0 : i32
    %c0_i32_0 = arith.constant 0 : i32
    %c0_i32_1 = arith.constant 0 : i32
    return %c0_i32, %c0_i32_0 : i32, i32
  }
  func.func @transform_3(%arg0: i32) -> (i32, i32) {
    %c0_i32 = arith.constant 0 : i32
    %c0_i32_0 = arith.constant 0 : i32
    %c0_i32_1 = arith.constant 0 : i32
    return %c0_i32, %c0_i32_0 : i32, i32
  }
  func.func @transform_4(%arg0: i32) -> (i32, i32) {
    %c0_i32 = arith.constant 0 : i32
    %c0_i32_0 = arith.constant 0 : i32
    %c0_i32_1 = arith.constant 0 : i32
    return %c0_i32, %c0_i32_0 : i32, i32
  }
  func.func @transform_5(%arg0: i32) -> (i32, i32) {
    %c0_i32 = arith.constant 0 : i32
    %c0_i32_0 = arith.constant 0 : i32
    %c0_i32_1 = arith.constant 0 : i32
    return %c0_i32, %c0_i32_0 : i32, i32
  }
  func.func @transform_6(%arg0: i32) -> (i32, i32) {
    %c0_i32 = arith.constant 0 : i32
    %c0_i32_0 = arith.constant 0 : i32
    %c0_i32_1 = arith.constant 0 : i32
    return %c0_i32, %c0_i32_0 : i32, i32
  }
  func.func @transform_7(%arg0: i32) -> (i32, i32) {
    %c0_i32 = arith.constant 0 : i32
    %c0_i32_0 = arith.constant 0 : i32
    return %c0_i32, %arg0 : i32, i32
  }
}

</mosaic_0001>

<bundles_post_ra>
// kernel: classifier_mlp_forward.1
= control target key start
LH: loop header
LB: loop body
LE: loop exit
PB: predicated region body
PF: predicated region fallthrough
CT: control target
= control target key end

     0   :  { %12 = vsyncpa [#allocation3], 0  ;;  %s2098_s0 = inlined_call_operand.vmem [shape: f32[2,1024], index: 0, kind: input, shape index: {}]   ;;  %s2099_s1 = inlined_call_operand.vmem [shape: f32[32,2], index: 1, kind: input, shape index: {}]   ;;  %s2100_s2 = inlined_call_operand.vmem [shape: f32[32,1], index: 2, kind: input, shape index: {}]   ;;  %s2101_s3 = inlined_call_operand.vmem [shape: f32[32,32], index: 3, kind: input, shape index: {}]   ;;  %s2102_s4 = inlined_call_operand.vmem [shape: f32[32,1], index: 4, kind: input, shape index: {}]   ;;  %s2103_s5 = inlined_call_operand.vmem [shape: f32[4,32], index: 5, kind: input, shape index: {}]   ;;  %s2104_s6 = inlined_call_operand.vmem [shape: f32[4,1], index: 6, kind: input, shape index: {}]   ;;  %s2105_s7 = inlined_call_operand.hbm [shape: f32[4,1024], index: 7, kind: output, shape index: {}]  }
   0x1   :  { %14 = vsyncpa [#allocation3 + $0x1], 0  ;;  %s1683_s24 = smov 0   ;;  %s1685_s25 = smov 0  }
   0x2   :  { %s1687_s26 = smov 0   ;;  %s1689_s27 = smov 0  }
   0x3 LB: > { %s1704_s28 = sadd.s32 4294967295, %s1639_s27   ;;  %s1506_s29 = sadd.s32 4294967294, %s1639_s27   ;;  %s1639_s27 = sphi %s1689_s27, %s2111_s27   ;;  %s1635_s26 = sphi %s1687_s26, %s2110_s26   ;;  %s1631_s25 = sphi %s1685_s25, %s2109_s25   ;;  %s1627_s24 = sphi %s1683_s24, %s2108_s24  }
   0x4   : > { %s1708_s30 = sadd.s32 1, %s1639_s27   ;;  %s179_s8 = sadd.s32 1, %s1635_s26 }
   0x5   : > { %s176_s9 = ssub.s32 %s1639_s27, %s1708_s30  ;;  %p189_p0 = scmp.ne.s32.totalorder %s1635_s26, %s1631_s25 }
   0x6   : > { %p177_p1 = scmp.eq.s32.totalorder %s176_s9, 0  ;;  %p190_p2 = scmp.eq.s32.totalorder %s1704_s28, 3 }
   0x7   : > { %p195_p3 = scmp.ne.s32.totalorder %s1631_s25, %s1627_s24  ;;  %p196_p4 = scmp.eq.s32.totalorder %s1506_s29, 3 }
   0x8   : > { %s1719_s10 = scalar_select %p177_p1, %s1635_s26, %s179_s8  }
   0x9   : > { %p1721_p5 = por %p190_p2, %p189_p0  ;;  %p1725_p6 = por %p196_p4, %p195_p3 }
   0xa   : > { %p1509_p7 = scmp.ge.s32.totalorder %s1639_s27, 1  ;;  %p241_p8 = scmp.lt.s32.totalorder %s1639_s27, 5 }
   0xc   : > { %p242_p9 = pnand %p1509_p7, %p241_p8 }
   0xd   : > { %s1511_s19 = sshll.u32 (!%p242_p9), %s1704_s28, 1  ;;  %s270_s9 = sand.u32 (!%p242_p9), 1, %s1631_s25  }
   0xe   : > { %245 = sbr.rel (%p242_p9) target bundleno = 623 (0x26f), region = 48  ;;  %p274_p10 = scmp.lt.s32.totalorder (!%p242_p9), %s1511_s19, 7 }
   0xf   : > { %s1510_s13 = sshll.u32 (!%p242_p9), %s270_s9, 3  ;;  %s1518_s14 = sshll.u32 (!%p242_p9), %s1704_s28, 3 }
  0x10   : > { %s1442_s17 = scalar_lea.hbm (!%p242_p9), %s2105_s7, %s1518_s14  ;;  %s272_s18 = scalar_lea.vmem (!%p242_p9), [#allocation2], %s1510_s13 }
  0x11   : > { %s1431_s28 = scalar_lea.sflag (!%p242_p9), [#allocation3], %s270_s9  ;;  %s1597_s8 = scalar_lea.hbm (!%p242_p9), %s2105_s7, 32 }
  0x13   : > { %v323_v0 = vld [vmem:[%s2100_s2 + $0x18] sm:$0xff]  ;;  %v282_v2 = vld [vmem:[%s2099_s1 + $0x8] sm:$0xff]  ;;  %v1641_v3 = vmov 0   ;;  %v283_v4 = vld [vmem:[%s2099_s1 + $0x10] sm:$0xff]  ;;  %v1642_v6 = vmov 1   ;;  %s2113_s19 = smov (!%p274_p10, %s1511_s19), 7 }
  0x14   : > { %v284_v1 = vld [vmem:[%s2099_s1 + $0x18] sm:$0xff]  ;;  %1563 = vset.pattern.permute.xlu2 %v1641_v3  ;;  %1561 = vset.pattern.permute.xlu1 %v1641_v3  ;;  %v322_v5 = vld [vmem:[%s2100_s2 + $0x10] sm:$0xff]  ;;  %v321_v7 = vld [vmem:[%s2100_s2 + $0x8] sm:$0xff]  ;;  %s1512_s20 = sshll.u32 %s2113_s19, 1  ;;  %vm426_vm0 = vcmask 261120   ;;  %vm1383_vm1 = vcmask 1043456  }
  0x15   : > { %1560 = vset.pattern.permute.xlu0 %v1641_v3  ;;  %341 = vperm.xlu1 %1561, %v323_v0   ;;  %v281_v8 = vld [vmem:[%s2099_s1] sm:$0xff]  ;;  %v404_v10 = vld [vmem:[%s2102_s4 + $0x10] sm:$0xff]  ;;  %s277_s23 = scalar_lea.vmem %s2098_s0, %s1512_s20  ;;  %v405_v49 = vld [vmem:[%s2102_s4 + $0x18] sm:$0xff]  ;;  %s1444_s19 = sshll.u32 %s272_s18, 4  ;;  %s1445_s19 = int_to_ptr.vmem [resolvable:$true] %s1444_s19 }
  0x16   : > { %302 = vperm.xlu0 %1560, %v284_v1   ;;  %292 = vperm.xlu2 %1563, %v282_v2   ;;  %v320_v9 = vld [vmem:[%s2100_s2] sm:$0xff]  ;;  %v399_v0 = vld [vmem:[%s2101_s3 + $0x8] sm:$0xff]  ;;  %s1446_s20 = sshll.u32 %s1442_s17, 4  ;;  %s1447_s20 = int_to_ptr.hbm [resolvable:$true] %s1446_s20 }
  0x17   : > { %v1004_v11 = vld [vmem:[%s2104_s6] sm:$0xf]  ;;  %s1591_s21 = sshra.s32 %s1447_s20, 4  ;;  %s1592_s21 = int_to_ptr.hbm [resolvable:$true] %s1591_s21 }
  0x18   : > { %v280_v13 = vld [vmem:[%s277_s23] sm:$0xf]  ;;  %s1593_s22 = scalar_lea.hbm %s1592_s21, 8  ;;  %p1598_p0 = scmp.lt.s32.totalorder %s1592_s21, %s2105_s7 }
  0x19   : > { %v306_v14 = vperm.slane %v280_v13, 0  ;;  %v307_v15 = vperm.slane %v280_v13, 2  ;;  %v368_v19 = vperm.slane %v280_v13, 1  ;;  %v369_v20 = vperm.slane %v280_v13, 3  ;;  %v398_v36 = vld [vmem:[%s2101_s3] sm:$0xff]  ;;  %p1594_p11 = scmp.ne.s32.totalorder %s1592_s21, %s1593_s22  ;;  %p1599_p1 = scmp.lt.s32.totalorder %s1597_s8, %s1593_s22 }
  0x1a   : > { %v428_v41 = vsel %vm426_vm0, %v398_v36, 0 }
  0x1b   : > { %v310_v18 = vperm.slane %v306_v14, 0  ;;  %v311_v21 = vperm.slane %v307_v15, 0  ;;  %v1765_v24 = vperm.slane %v368_v19, 1  ;;  %v1767_v25 = vperm.slane %v369_v20, 1  ;;  %p1595_p12 = pnand %p1594_p11, %p1721_p5  ;;  %p1600_p2 = por %p1599_p1, %p1598_p0 }
  0x1c   : > { %v1787_v51 = vand.u32 4294901760, %v428_v41 }
  0x1d   : > { %1562 = vset.pattern.permute.xlu1 %v1642_v6  ;;  %p1596_p13 = pneg %p1595_p12 }
  0x1e   : > { %297 = vperm.xlu0 %1560, %v283_v4   ;;  %336 = vperm.xlu2 %1563, %v322_v5   ;;  %v1797_v63 = vsub.f32 %v428_v41, %v1787_v51  ;;  %v400_v41 = vld [vmem:[%s2101_s3 + $0x10] sm:$0xff] }
  0x1f   : > { %365 = vperm.xlu1 %1562, %v284_v1   ;;  %p1601_p3 = pnand %p1600_p2, %p1596_p13 }
  0x26   : > { %1564 = vset.pattern.permute.xlu0 %v1642_v6  ;;  %331 = vperm.xlu2 %1563, %v321_v7  }
  0x27   : > { %1565 = vset.pattern.permute.xlu1 %v1641_v3  ;;  %361 = vperm.xlu0 %1564, %v283_v4  }
  0x28   : > { %287 = vperm.xlu1 %1565, %v281_v8  }
  0x2e   : > { %326 = vperm.xlu2 %1563, %v320_v9  }
  0x2f   : > { %353 = vperm.xlu0 %1564, %v281_v8  }
  0x30   : > { %1566 = vset.pattern.permute.xlu1 %v1642_v6 }
  0x31   : > { %357 = vperm.xlu1 %1566, %v282_v2  }
  0x36   : > { %418 = vperm.xlu2 %1563, %v404_v10  }
  0x37   : > { %1568 = vset.pattern.permute.xlu0 %v1641_v3 }
  0x39   : > { %1567 = vset.pattern.permute.xlu1 %v1641_v3 }
  0x3a   : > { %423 = vperm.xlu1 %1567, %v405_v49  }
  0x3e   : > { %1007 = vperm.xlu2 %1563, %v1004_v11   ;;  %v431_v11 = vsel %vm426_vm0, %v399_v0, 0 }
  0x70   : > { %v293_v12 = vpop.permute.xlu2 %292 }
  0x71   : > { %v314_v60 = vmul.f32 %v310_v18, %v293_v12  ;;  %v315_v61 = vmul.f32 %v311_v21, %v293_v12 }
  0x78   : > { %v337_v22 = vpop.permute.xlu2 %336 }
  0x80   : > { %v332_v37 = vpop.permute.xlu2 %331 }
  0x81   : > { %v346_v12 = vadd.f32 %v332_v37, %v314_v60  ;;  %v347_v13 = vadd.f32 %v332_v37, %v315_v61 }
  0x87   : > { %v342_v16 = vpop.permute.xlu1 %341 }
  0x88   : > { %v303_v17 = vpop.permute.xlu0 %302  ;;  %v327_v1 = vpop.permute.xlu2 %326 }
  0x89   : > { %v318_v23 = vmul.f32 %v310_v18, %v303_v17  ;;  %v319_v26 = vmul.f32 %v311_v21, %v303_v17  ;;  %v402_v17 = vld [vmem:[%s2102_s4] sm:$0xff] }
  0x8a   : > { %408 = vperm.xlu1 %1567, %v402_v17  }
  0x8b   : > { %v350_v29 = vadd.f32 %v342_v16, %v318_v23  ;;  %v351_v32 = vadd.f32 %v342_v16, %v319_v26  ;;  %v1818_v16 = vand.u32 4294901760, %v1797_v63 }
  0x90   : > { %v298_v27 = vpop.permute.xlu0 %297 }
  0x91   : > { %v366_v28 = vpop.permute.xlu1 %365  ;;  %v316_v34 = vmul.f32 %v310_v18, %v298_v27  ;;  %v317_v38 = vmul.f32 %v311_v21, %v298_v27  ;;  %v1831_v27 = vand.u32 4294901760, %v431_v11 }
  0x92   : > { %v380_v30 = vmul.f32 %v1765_v24, %v366_v28  ;;  %v381_v31 = vmul.f32 %v1767_v25, %v366_v28 }
  0x93   : > { %v348_v42 = vadd.f32 %v337_v22, %v316_v34  ;;  %v349_v45 = vadd.f32 %v337_v22, %v317_v38 }
  0x94   : > { %v388_v33 = vadd.f32 %v380_v30, %v350_v29  ;;  %v389_v35 = vadd.f32 %v381_v31, %v351_v32 }
  0x96   : > { %v396_v39 = vmax.f32 %v388_v33, 0.0  ;;  %v397_v43 = vmax.f32 %v389_v35, 0.0 }
  0x98   : > { %v1774_v40 = vand.u32 4294901760, %v396_v39  ;;  %v1789_v54 = vand.u32 4294901760, %v397_v43 }
  0x99   : > { %v362_v44 = vpop.permute.xlu0 %361 }
  0x9a   : > { %v378_v46 = vmul.f32 %v1765_v24, %v362_v44  ;;  %v379_v47 = vmul.f32 %v1767_v25, %v362_v44  ;;  %v288_v48 = vpop.permute.xlu1 %287  ;;  %452 = vmatpush.msra.mxu0 %v1774_v40  ;;  %603 = vmatpush.msra.mxu3 %v1774_v40  ;;  %v1785_v50 = vsub.f32 %v396_v39, %v1774_v40 }
  0x9b   : > { %v312_v55 = vmul.f32 %v310_v18, %v288_v48  ;;  %v313_v59 = vmul.f32 %v311_v21, %v288_v48  ;;  %v1805_v3 = vsub.f32 %v397_v43, %v1789_v54  ;;  %v1845_v39 = vsub.f32 %v431_v11, %v1831_v27 }
  0x9c   : > { %v386_v52 = vadd.f32 %v378_v46, %v348_v42  ;;  %v387_v53 = vadd.f32 %v379_v47, %v349_v45  ;;  %559 = vmatpush.msra.mxu2 %v1785_v50  ;;  %v506_v56 = vand.u32 4294901760, %v1785_v50  ;;  %v403_v47 = vld [vmem:[%s2102_s4 + $0x8] sm:$0xff] }
  0x9d   : > { %v344_v5 = vadd.f32 %v327_v1, %v312_v55  ;;  %v345_v8 = vadd.f32 %v327_v1, %v313_v59  ;;  %v784_v26 = vand.u32 4294901760, %v1805_v3  ;;  %413 = vperm.xlu0 %1568, %v403_v47  }
  0x9e   : > { %v394_v57 = vmax.f32 %v386_v52, 0.0  ;;  %v395_v58 = vmax.f32 %v387_v53, 0.0  ;;  %v507_v62 = vsub.f32 %v1785_v50, %v506_v56  ;;  %v434_v53 = vsel %vm426_vm0, %v400_v41, 0  ;;  %v401_v50 = vld [vmem:[%s2101_s3 + $0x18] sm:$0xff] }
  0x9f   : > { %v785_v37 = vsub.f32 %v1805_v3, %v784_v26 }
  0xa0   : > { %v1802_v2 = vand.u32 4294901760, %v394_v57  ;;  %v1807_v4 = vand.u32 4294901760, %v395_v58  ;;  %v508_v7 = vand.u32 4294901760, %v507_v62  ;;  %v1881_v62 = vand.u32 4294901760, %v434_v53 }
  0xa1   : > { %v354_v6 = vpop.permute.xlu0 %353  ;;  %v786_v59 = vand.u32 4294901760, %v785_v37 }
  0xa2   : > { %v374_v9 = vmul.f32 %v1765_v24, %v354_v6  ;;  %v375_v10 = vmul.f32 %v1767_v25, %v354_v6  ;;  %454 = vmatpush.msra.mxu0 %v1802_v2  ;;  %605 = vmatpush.msra.mxu3 %v1802_v2  ;;  %v1815_v15 = vsub.f32 %v394_v57, %v1802_v2 }
  0xa3   : > { %509 = vmatpush.msra.mxu1 %v508_v7  ;;  %v358_v14 = vpop.permute.xlu1 %357  ;;  %v1826_v22 = vsub.f32 %v395_v58, %v1807_v4  ;;  %v1875_v58 = vand.u32 4294901760, %v1845_v39 }
  0xa4   : > { %v382_v18 = vadd.f32 %v374_v9, %v344_v5  ;;  %v383_v19 = vadd.f32 %v375_v10, %v345_v8  ;;  %v376_v20 = vmul.f32 %v1765_v24, %v358_v14  ;;  %v377_v21 = vmul.f32 %v1767_v25, %v358_v14  ;;  %562 = vmatpush.msra.mxu2 %v1815_v15 }
  0xa5   : > { %v512_v23 = vand.u32 4294901760, %v1815_v15  ;;  %v462_v25 = vsub.f32 %v1797_v63, %v1818_v16  ;;  %v790_v38 = vand.u32 4294901760, %v1826_v22  ;;  %v470_v8 = vsub.f32 %v1845_v39, %v1875_v58 }
  0xa6   : > { %v390_v28 = vmax.f32 %v382_v18, 0.0  ;;  %v391_v29 = vmax.f32 %v383_v19, 0.0  ;;  %v384_v30 = vadd.f32 %v376_v20, %v346_v12  ;;  %v385_v31 = vadd.f32 %v377_v21, %v347_v13 }
  0xa7   : > { %v513_v24 = vsub.f32 %v1815_v15, %v512_v23  ;;  %v1858_v46 = vand.u32 4294901760, %v462_v25  ;;  %v791_v55 = vsub.f32 %v1826_v22, %v790_v38  ;;  %v1898_v10 = vsub.f32 %v434_v53, %v1881_v62 }
  0xa8   : > { %v1836_v32 = vand.u32 4294901760, %v390_v28  ;;  %v1838_v33 = vand.u32 4294901760, %v391_v29  ;;  %v392_v34 = vmax.f32 %v384_v30, 0.0  ;;  %v393_v35 = vmax.f32 %v385_v31, 0.0 }
  0xa9   : > { %v514_v36 = vand.u32 4294901760, %v513_v24  ;;  %v792_v6 = vand.u32 4294901760, %v791_v55  ;;  %v437_v12 = vsel %vm426_vm0, %v401_v50, 0  ;;  %v471_v14 = vand.u32 4294901760, %v470_v8 }
  0xaa   : > { %v1851_v42 = vsub.f32 %v391_v29, %v1838_v33  ;;  %v1853_v43 = vand.u32 4294901760, %v392_v34  ;;  %v1855_v44 = vand.u32 4294901760, %v393_v35  ;;  %v523_v45 = vsub.f32 %v390_v28, %v1836_v32 }
  0xab   : > { %515 = vmatpush.msra.mxu1 %v514_v36  ;;  %v1904_v15 = vand.u32 4294901760, %v1898_v10  ;;  %v1906_v17 = vand.u32 4294901760, %v437_v12 }
  0xac   : > { %v1864_v48 = vsub.f32 %v393_v35, %v1855_v44  ;;  %456 = vmatpush.msra.mxu0 %v1853_v43  ;;  %607 = vmatpush.msra.mxu3 %v1853_v43  ;;  %v517_v49 = vsub.f32 %v392_v34, %v1853_v43  ;;  %v524_v52 = vand.u32 4294901760, %v523_v45  ;;  %v802_v57 = vand.u32 4294901760, %v1851_v42  ;;  %v1969_v31 = vpop.permute.xlu1 %423 }
  0xad   : > { %v478_v18 = vsub.f32 %v1898_v10, %v1904_v15  ;;  %v484_v19 = vsub.f32 %v437_v12, %v1906_v17 }
  0xae   : > { %458 = vmatpush.msra.mxu0 %v1836_v32  ;;  %565 = vmatpush.msra.mxu2 %v517_v49  ;;  %v518_v60 = vand.u32 4294901760, %v517_v49  ;;  %v796_v61 = vand.u32 4294901760, %v1864_v48  ;;  %v525_v5 = vsub.f32 %v523_v45, %v524_v52  ;;  %v803_v7 = vsub.f32 %v1851_v42, %v802_v57 }
  0xaf   : > { %609 = vmatpush.msra.mxu3 %v1836_v32  ;;  %464 = vmatmul.f32.vlgmr.msra.gmra.mxu0 %v1858_v46 }
  0xb0   : > { %650 = vmatpush.msrb.mxu0 %v506_v56  ;;  %v519_v0 = vsub.f32 %v517_v49, %v518_v60  ;;  %v797_v1 = vsub.f32 %v1864_v48, %v796_v61  ;;  %568 = vmatpush.msra.mxu2 %v523_v45  ;;  %v526_v11 = vand.u32 4294901760, %v525_v5  ;;  %v804_v13 = vand.u32 4294901760, %v803_v7 }
  0xb1   : > { %787 = vmatpush.msrb.mxu3 %v786_v59  ;;  %571 = vmatmul.f32.vlgmr.msra.gmra.mxu2 %v1797_v63 }
  0xb2   : > { %613 = vmatmul.f32.vlgmr.msra.gmra.mxu3 %v1818_v16  ;;  %654 = vmatpush.msrb.mxu0 %v512_v23  ;;  %v520_v56 = vand.u32 4294901760, %v519_v0  ;;  %v798_v9 = vand.u32 4294901760, %v797_v1 }
  0xb3   : > { %730 = vmatpush.msrb.mxu2 %v1789_v54  ;;  %793 = vmatpush.msrb.mxu3 %v792_v6 }
  0xb4   : > { %658 = vmatpush.msrb.mxu0 %v518_v60  ;;  %521 = vmatpush.msra.mxu1 %v520_v56  ;;  %v1003_v60 = vld [vmem:[%s2103_s5] sm:$0xf] }
  0xb5   : > { %732 = vmatpush.msrb.mxu2 %v1807_v4  ;;  %799 = vmatpush.msrb.mxu3 %v798_v9  ;;  %v1011_v8 = vsel %vm426_vm0, %v1003_v60, 0 }
  0xb6   : > { %662 = vmatpush.msrb.mxu0 %v524_v52  ;;  %527 = vmatpush.msra.mxu1 %v526_v11 }
  0xb7   : > { %734 = vmatpush.msrb.mxu2 %v1855_v44  ;;  %805 = vmatpush.msrb.mxu3 %v804_v13 }
  0xb8   : > { %837 = vmatpush.msra.mxu0 %v1805_v3  ;;  %529 = vmatmul.f32.vlgmr.msra.gmra.mxu1 %v1787_v51  ;;  %v485_v3 = vand.u32 4294901760, %v484_v19 }
  0xb9   : > { %472 = vmatmul.f32.gmra.mxu0 %v471_v14  ;;  %693 = vmatpush.msrb.mxu1 %v1774_v40  ;;  %v479_v40 = vand.u32 4294901760, %v478_v18 }
  0xba   : > { %736 = vmatpush.msrb.mxu2 %v1838_v33  ;;  %971 = vmatpush.msra.mxu3 %v1789_v54 }
  0xbb   : > { %840 = vmatpush.msra.mxu0 %v1826_v22  ;;  %576 = vmatmul.f32.gmra.mxu2 %v1845_v39 }
  0xbc   : > { %928 = vmatpush.msra.mxu2 %v784_v26  ;;  %695 = vmatpush.msrb.mxu1 %v1802_v2  ;;  %v486_v2 = vsub.f32 %v484_v19, %v485_v3 }
  0xbd   : > { %973 = vmatpush.msra.mxu3 %v1807_v4  ;;  %843 = vmatpush.msra.mxu0 %v1864_v48 }
  0xbe   : > { %932 = vmatpush.msra.mxu2 %v790_v38  ;;  %619 = vmatmul.f32.gmra.mxu3 %v1875_v58  ;;  %v487_v20 = vand.u32 4294901760, %v486_v2 }
  0xbf   : > { %697 = vmatpush.msrb.mxu1 %v1853_v43  ;;  %975 = vmatpush.msra.mxu3 %v1855_v44 }
  0xc0   : > { %846 = vmatpush.msra.mxu0 %v1851_v42  ;;  %936 = vmatpush.msra.mxu2 %v796_v61  ;;  %v1980_v42 = vpop.permute.xlu2 %418 }
  0xc1   : > { %699 = vmatpush.msrb.mxu1 %v1836_v32  ;;  %977 = vmatpush.msra.mxu3 %v1838_v33 }
  0xc2   : > { %940 = vmatpush.msra.mxu2 %v802_v57  ;;  %480 = vmatmul.f32.gmra.mxu0 %v479_v40 }
  0xc3   : > { %881 = vmatpush.msra.mxu1 %v1789_v54  ;;  %581 = vmatmul.f32.gmra.mxu2 %v1898_v10 }
  0xc4   : > { %533 = vmatmul.f32.gmra.mxu1 %v1831_v27 }
  0xc5   : > { %883 = vmatpush.msra.mxu1 %v1807_v4 }
  0xc6   : > { %625 = vmatmul.f32.gmra.mxu3 %v1904_v15 }
  0xc7   : > { %885 = vmatpush.msra.mxu1 %v1855_v44 }
  0xc9   : > { %887 = vmatpush.msra.mxu1 %v1838_v33 }
  0xca   : > { %488 = vmatmul.f32.gmra.mxu0 %v487_v20 }
  0xcb   : > { %586 = vmatmul.f32.gmra.mxu2 %v484_v19 }
  0xcc   : > { %537 = vmatmul.f32.gmra.mxu1 %v1881_v62 }
  0xce   : > { %631 = vmatmul.f32.gmra.mxu3 %v485_v3 }
  0xd2   : > { %664 = vmatmul.f32.vlgmr.msrb.gmra.mxu0 %v1787_v51 }
  0xd3   : > { %742 = vmatmul.f32.vlgmr.msrb.gmra.mxu2 %v1858_v46 }
  0xd4   : > { %541 = vmatmul.f32.gmra.mxu1 %v1906_v17 }
  0xd6   : > { %807 = vmatmul.f32.vlgmr.msrb.gmra.mxu3 %v1787_v51 }
  0xda   : > { %668 = vmatmul.f32.gmra.mxu0 %v1831_v27 }
  0xdb   : > { %750 = vmatmul.f32.gmra.mxu2 %v471_v14  ;;  %v1997_v14 = vand.u32 4294901760, %v1011_v8 }
  0xdc   : > { %701 = vmatmul.f32.vlgmr.msrb.gmra.mxu1 %v1787_v51 }
  0xde   : > { %811 = vmatmul.f32.gmra.mxu3 %v1831_v27 }
  0xe2   : > { %672 = vmatmul.f32.gmra.mxu0 %v1881_v62 }
  0xe3   : > { %758 = vmatmul.f32.gmra.mxu2 %v479_v40  ;;  %v2000_v40 = vsub.f32 %v1011_v8, %v1997_v14 }
  0xe4   : > { %705 = vmatmul.f32.gmra.mxu1 %v1831_v27 }
  0xe6   : > { %815 = vmatmul.f32.gmra.mxu3 %v1881_v62 }
  0xea   : > { %676 = vmatmul.f32.gmra.mxu0 %v1906_v17 }
  0xeb   : > { %766 = vmatmul.f32.gmra.mxu2 %v487_v20 }
  0xec   : > { %709 = vmatmul.f32.gmra.mxu1 %v1881_v62 }
  0xee   : > { %819 = vmatmul.f32.gmra.mxu3 %v1906_v17 }
  0xf2   : > { %849 = vmatmul.f32.vlgmr.msra.gmra.mxu0 %v1797_v63 }
  0xf3   : > { %942 = vmatmul.f32.vlgmr.msra.gmra.mxu2 %v1787_v51 }
  0xf4   : > { %713 = vmatmul.f32.gmra.mxu1 %v1906_v17 }
  0xf6   : > { %979 = vmatmul.f32.vlgmr.msra.gmra.mxu3 %v1787_v51 }
  0xfa   : > { %854 = vmatmul.f32.gmra.mxu0 %v1845_v39 }
  0xfb   : > { %946 = vmatmul.f32.gmra.mxu2 %v1831_v27 }
  0xfc   : > { %891 = vmatmul.f32.vlgmr.msra.gmra.mxu1 %v1818_v16  ;;  %v1973_v35 = vpop.permute.xlu1 %408 }
  0xfe   : > { %983 = vmatmul.f32.gmra.mxu3 %v1831_v27 }
 0x102   : > { %859 = vmatmul.f32.gmra.mxu0 %v1898_v10 }
 0x103   : > { %950 = vmatmul.f32.gmra.mxu2 %v1881_v62 }
 0x104   : > { %897 = vmatmul.f32.gmra.mxu1 %v1875_v58 }
 0x106   : > { %987 = vmatmul.f32.gmra.mxu3 %v1881_v62 }
 0x10a   : > { %864 = vmatmul.f32.gmra.mxu0 %v484_v19 }
 0x10b   : > { %954 = vmatmul.f32.gmra.mxu2 %v1906_v17 }
 0x10c   : > { %903 = vmatmul.f32.gmra.mxu1 %v1904_v15 }
 0x10e   : > { %991 = vmatmul.f32.gmra.mxu3 %v1906_v17 }
 0x10f   : > { %v1971_v34 = vpop.permute.xlu0 %413 }
 0x114   : > { %909 = vmatmul.f32.gmra.mxu1 %v485_v3 }
 0x12c   : > { %v465_v51 = vpop.f32.mrf.mxu0 }
 0x12d   : > { %v466_v43 = vadd.f32 %v465_v51, %v1973_v35 }
 0x134   : > { %v572_v54 = vpop.f32.mrf.mxu2 }
 0x135   : > { %v530_v4 = vpop.f32.mrf.mxu1  ;;  %v614_v16 = vpop.f32.mrf.mxu3 }
 0x136   : > { %v473_v63 = vpop.f32.mrf.mxu0  ;;  %v531_v47 = vadd.f32 %v530_v4, %v466_v43 }
 0x137   : > { %v474_v39 = vadd.f32 %v473_v63, %v1971_v34 }
 0x138   : > { %v573_v59 = vadd.f32 %v572_v54, %v531_v47 }
 0x13a   : > { %v615_v1 = vadd.f32 %v614_v16, %v573_v59 }
 0x13e   : > { %v577_v21 = vpop.f32.mrf.mxu2 }
 0x13f   : > { %v481_v22 = vpop.f32.mrf.mxu0 }
 0x140   : > { %v482_v44 = vadd.f32 %v481_v22, %v1980_v42  ;;  %v2011_v22 = vand.u32 4294901760, %v2000_v40 }
 0x141   : > { %v534_v23 = vpop.f32.mrf.mxu1  ;;  %v620_v26 = vpop.f32.mrf.mxu3 }
 0x142   : > { %v535_v45 = vadd.f32 %v534_v23, %v474_v39 }
 0x144   : > { %v578_v53 = vadd.f32 %v577_v21, %v535_v45 }
 0x146   : > { %v582_v27 = vpop.f32.mrf.mxu2  ;;  %v621_v61 = vadd.f32 %v620_v26, %v578_v53 }
 0x147   : > { %v489_v28 = vpop.f32.mrf.mxu0 }
 0x148   : > { %v490_v55 = vadd.f32 %v489_v28, %v1969_v31 }
 0x149   : > { %v538_v29 = vpop.f32.mrf.mxu1  ;;  %v626_v30 = vpop.f32.mrf.mxu3 }
 0x14a   : > { %v539_v46 = vadd.f32 %v538_v29, %v482_v44 }
 0x14c   : > { %v583_v57 = vadd.f32 %v582_v27, %v539_v46 }
 0x14e   : > { %v587_v24 = vpop.f32.mrf.mxu2  ;;  %v627_v62 = vadd.f32 %v626_v30, %v583_v57  ;;  %v1036_v30 = vsub.f32 %v2000_v40, %v2011_v22 }
 0x14f   : > { %v665_v32 = vpop.f32.mrf.mxu0 }
 0x150   : > { %v666_v10 = vadd.f32 %v665_v32, %v615_v1  ;;  %v2026_v45 = vand.u32 4294901760, %v1036_v30 }
 0x151   : > { %v542_v25 = vpop.f32.mrf.mxu1  ;;  %v632_v33 = vpop.f32.mrf.mxu3 }
 0x152   : > { %v543_v0 = vadd.f32 %v542_v25, %v490_v55 }
 0x154   : > { %v588_v9 = vadd.f32 %v587_v24, %v543_v0 }
 0x156   : > { %v1975_v36 = vpop.f32.mrf.mxu2  ;;  %v633_v18 = vadd.f32 %v632_v33, %v588_v9 }
 0x157   : > { %v669_v37 = vpop.f32.mrf.mxu0  ;;  %v744_v57 = vadd.f32 %v1975_v36, %v1973_v35 }
 0x158   : > { %v670_v5 = vadd.f32 %v669_v37, %v621_v61 }
 0x159   : > { %v702_v38 = vpop.f32.mrf.mxu1  ;;  %v1978_v41 = vpop.f32.mrf.mxu3 }
 0x15a   : > { %v703_v15 = vadd.f32 %v702_v38, %v666_v10  ;;  %v809_v35 = vadd.f32 %v1978_v41, %v744_v57 }
 0x15c   : > { %v995_v3 = vmax.f32 %v703_v15, 0.0 }
 0x15e   : > { %v1984_v48 = vpop.f32.mrf.mxu2  ;;  %v2013_v23 = vand.u32 4294901760, %v995_v3 }
 0x15f   : > { %v673_v49 = vpop.f32.mrf.mxu0 }
 0x160   : > { %v674_v6 = vadd.f32 %v673_v49, %v627_v62  ;;  %v1073_v24 = vsub.f32 %v995_v3, %v2013_v23 }
 0x161   : > { %v706_v52 = vpop.f32.mrf.mxu1  ;;  %v1987_v58 = vpop.f32.mrf.mxu3 }
 0x162   : > { %v707_v11 = vadd.f32 %v706_v52, %v670_v5  ;;  %v1074_v49 = vand.u32 4294901760, %v1073_v24  ;;  %v752_v52 = vadd.f32 %v1984_v48, %v1971_v34 }
 0x164   : > { %v997_v19 = vmax.f32 %v707_v11, 0.0  ;;  %v1075_v61 = vsub.f32 %v1073_v24, %v1074_v49  ;;  %v813_v34 = vadd.f32 %v1987_v58, %v752_v52 }
 0x166   : > { %v1992_v7 = vpop.f32.mrf.mxu2  ;;  %v2006_v4 = vand.u32 4294901760, %v997_v19 }
 0x167   : > { %v677_v50 = vpop.f32.mrf.mxu0  ;;  %v760_v48 = vadd.f32 %v1992_v7, %v1980_v42 }
 0x168   : > { %v678_v2 = vadd.f32 %v677_v50, %v633_v18  ;;  %v1067_v28 = vsub.f32 %v997_v19, %v2006_v4 }
 0x169   : > { %v710_v56 = vpop.f32.mrf.mxu1  ;;  %v1995_v13 = vpop.f32.mrf.mxu3 }
 0x16a   : > { %v711_v12 = vadd.f32 %v710_v56, %v674_v6  ;;  %v1068_v44 = vand.u32 4294901760, %v1067_v28  ;;  %v1076_v6 = vand.u32 4294901760, %v1075_v61  ;;  %v817_v8 = vadd.f32 %v1995_v13, %v760_v48 }
 0x16c   : > { %v999_v17 = vmax.f32 %v711_v12, 0.0  ;;  %v1069_v55 = vsub.f32 %v1067_v28, %v1068_v44 }
 0x16e   : > { %v2002_v20 = vand.u32 4294901760, %v999_v17  ;;  %v2004_v51 = vpop.f32.mrf.mxu2  ;;  %v1070_v0 = vand.u32 4294901760, %v1069_v55 }
 0x16f   : > { %v850_v63 = vpop.f32.mrf.mxu0  ;;  %v768_v41 = vadd.f32 %v2004_v51, %v1969_v31 }
 0x170   : > { %v1061_v26 = vsub.f32 %v999_v17, %v2002_v20  ;;  %v851_v50 = vadd.f32 %v850_v63, %v809_v35 }
 0x171   : > { %v714_v54 = vpop.f32.mrf.mxu1  ;;  %v2008_v21 = vpop.f32.mrf.mxu3 }
 0x172   : > { %v715_v16 = vadd.f32 %v714_v54, %v678_v2  ;;  %v1062_v33 = vand.u32 4294901760, %v1061_v26  ;;  %v821_v18 = vadd.f32 %v2008_v21, %v768_v41 }
 0x174   : > { %v1001_v27 = vmax.f32 %v715_v16, 0.0  ;;  %v1063_v47 = vsub.f32 %v1061_v26, %v1062_v33 }
 0x176   : > { %v1025_v29 = vand.u32 4294901760, %v1001_v27  ;;  %v2020_v32 = vpop.f32.mrf.mxu2  ;;  %v1064_v59 = vand.u32 4294901760, %v1063_v47 }
 0x177   : > { %v855_v37 = vpop.f32.mrf.mxu0 }
 0x178   : > { %v1055_v25 = vsub.f32 %v1001_v27, %v1025_v29  ;;  %1026 = vmatpush.msrb.mxu0 %v1025_v29  ;;  %1126 = vmatpush.msrb.mxu3 %v1025_v29  ;;  %v856_v36 = vadd.f32 %v855_v37, %v813_v34 }
 0x179   : > { %v892_v38 = vpop.f32.mrf.mxu1  ;;  %v2023_v43 = vpop.f32.mrf.mxu3 }
 0x17a   : > { %v1056_v39 = vand.u32 4294901760, %v1055_v25  ;;  %1028 = vmatpush.msrb.mxu0 %v2002_v20  ;;  %1097 = vmatpush.msrb.mxu2 %v1055_v25  ;;  %v893_v42 = vadd.f32 %v892_v38, %v851_v50 }
 0x17b   : > { %1128 = vmatpush.msrb.mxu3 %v2002_v20 }
 0x17c   : > { %v1057_v46 = vsub.f32 %v1055_v25, %v1056_v39  ;;  %1030 = vmatpush.msrb.mxu0 %v2006_v4  ;;  %1100 = vmatpush.msrb.mxu2 %v1061_v26  ;;  %v944_v13 = vadd.f32 %v2020_v32, %v893_v42 }
 0x17d   : > { %1130 = vmatpush.msrb.mxu3 %v2006_v4 }
 0x17e   : > { %1032 = vmatpush.msrb.mxu0 %v2013_v23  ;;  %1103 = vmatpush.msrb.mxu2 %v1067_v28  ;;  %v1058_v53 = vand.u32 4294901760, %v1057_v46  ;;  %v947_v60 = vpop.f32.mrf.mxu2  ;;  %v981_v31 = vadd.f32 %v2023_v43, %v944_v13 }
 0x17f   : > { %1132 = vmatpush.msrb.mxu3 %v2013_v23  ;;  %1038 = vmatmul.f32.vlgmr.msrb.gmra.mxu0 %v2026_v45  ;;  %v860_v5 = vpop.f32.mrf.mxu0 }
 0x180   : > { %1155 = vmatpush.msra.mxu0 %v1056_v39  ;;  %1059 = vmatpush.msrb.mxu1 %v1058_v53  ;;  %v861_v7 = vadd.f32 %v860_v5, %v817_v8  ;;  %v996_v27 = vmax.f32 %v981_v31, 0.0 }
 0x181   : > { %1106 = vmatpush.msrb.mxu2 %v1073_v24  ;;  %v898_v62 = vpop.f32.mrf.mxu1  ;;  %1136 = vmatmul.f32.vlgmr.msrb.gmra.mxu3 %v2011_v22  ;;  %v984_v1 = vpop.f32.mrf.mxu3 }
 0x182   : > { %1159 = vmatpush.msra.mxu0 %v1062_v33  ;;  %1065 = vmatpush.msrb.mxu1 %v1064_v59  ;;  %v899_v58 = vadd.f32 %v898_v62, %v856_v36  ;;  %v1216_v30 = vand.u32 4294901760, %v996_v27 }
 0x183   : > { %1109 = vmatmul.f32.vlgmr.msrb.gmra.mxu2 %v2000_v40 }
 0x184   : > { %1163 = vmatpush.msra.mxu0 %v1068_v44  ;;  %1071 = vmatpush.msrb.mxu1 %v1070_v0  ;;  %v948_v10 = vadd.f32 %v947_v60, %v899_v58  ;;  %v1258_v33 = vsub.f32 %v996_v27, %v1216_v30 }
 0x186   : > { %1167 = vmatpush.msra.mxu0 %v1074_v49  ;;  %1077 = vmatpush.msrb.mxu1 %v1076_v6  ;;  %v951_v56 = vpop.f32.mrf.mxu2  ;;  %v985_v19 = vadd.f32 %v984_v1, %v948_v10  ;;  %v1259_v47 = vand.u32 4294901760, %v1258_v33 }
 0x187   : > { %1079 = vmatmul.f32.vlgmr.msrb.gmra.mxu1 %v1997_v14  ;;  %1169 = vmatmul.f32.vlgmr.msra.gmra.mxu0 %v1997_v14  ;;  %v865_v17 = vpop.f32.mrf.mxu0 }
 0x188   : > { %1186 = vmatpush.msra.mxu1 %v1025_v29  ;;  %v866_v2 = vadd.f32 %v865_v17, %v821_v18  ;;  %v998_v63 = vmax.f32 %v985_v19, 0.0  ;;  %v1260_v55 = vsub.f32 %v1258_v33, %v1259_v47 }
 0x189   : > { %v904_v9 = vpop.f32.mrf.mxu1  ;;  %v988_v12 = vpop.f32.mrf.mxu3 }
 0x18a   : > { %v905_v11 = vadd.f32 %v904_v9, %v861_v7  ;;  %1188 = vmatpush.msra.mxu1 %v2002_v20  ;;  %v1214_v29 = vand.u32 4294901760, %v998_v63  ;;  %v1261_v59 = vand.u32 4294901760, %v1260_v55 }
 0x18c   : > { %v952_v15 = vadd.f32 %v951_v56, %v905_v11  ;;  %1190 = vmatpush.msra.mxu1 %v2006_v4 }
 0x18e   : > { %v989_v3 = vadd.f32 %v988_v12, %v952_v15  ;;  %1192 = vmatpush.msra.mxu1 %v2013_v23  ;;  %v955_v54 = vpop.f32.mrf.mxu2  ;;  %v1252_v23 = vsub.f32 %v998_v63, %v1214_v29 }
 0x18f   : > { %1194 = vmatmul.f32.vlgmr.msra.gmra.mxu1 %v1997_v14 }
 0x190   : > { %v1000_v51 = vmax.f32 %v989_v3, 0.0  ;;  %v1253_v43 = vand.u32 4294901760, %v1252_v23 }
 0x191   : > { %v910_v20 = vpop.f32.mrf.mxu1  ;;  %v992_v26 = vpop.f32.mrf.mxu3 }
 0x192   : > { %v911_v16 = vadd.f32 %v910_v20, %v866_v2  ;;  %v1212_v4 = vand.u32 4294901760, %v1000_v51  ;;  %v1254_v52 = vsub.f32 %v1252_v23, %v1253_v43 }
 0x194   : > { %v956_v28 = vadd.f32 %v955_v54, %v911_v16  ;;  %v1246_v24 = vsub.f32 %v1000_v51, %v1212_v4  ;;  %v1255_v57 = vand.u32 4294901760, %v1254_v52 }
 0x196   : > { %v993_v21 = vadd.f32 %v992_v26, %v956_v28  ;;  %v1247_v38 = vand.u32 4294901760, %v1246_v24 }
 0x198   : > { %v1002_v25 = vmax.f32 %v993_v21, 0.0  ;;  %v1248_v46 = vsub.f32 %v1246_v24, %v1247_v38 }
 0x19a   : > { %v1210_v32 = vand.u32 4294901760, %v1002_v25  ;;  %v1249_v53 = vand.u32 4294901760, %v1248_v46 }
 0x19c   : > { %v1240_v37 = vsub.f32 %v1002_v25, %v1210_v32  ;;  %1211 = vmatpush.msra.mxu2 %v1210_v32  ;;  %1311 = vmatpush.msrb.mxu1 %v1210_v32 }
 0x19e   : > { %v1241_v39 = vand.u32 4294901760, %v1240_v37  ;;  %1213 = vmatpush.msra.mxu2 %v1212_v4  ;;  %1282 = vmatpush.msrb.mxu0 %v1240_v37 }
 0x19f   : > { %1313 = vmatpush.msrb.mxu1 %v1212_v4 }
 0x1a0   : > { %v1242_v44 = vsub.f32 %v1240_v37, %v1241_v39  ;;  %1215 = vmatpush.msra.mxu2 %v1214_v29  ;;  %1285 = vmatpush.msrb.mxu0 %v1246_v24 }
 0x1a1   : > { %1315 = vmatpush.msrb.mxu1 %v1214_v29 }
 0x1a2   : > { %1217 = vmatpush.msra.mxu2 %v1216_v30  ;;  %1288 = vmatpush.msrb.mxu0 %v1252_v23  ;;  %v1243_v49 = vand.u32 4294901760, %v1242_v44 }
 0x1a3   : > { %1317 = vmatpush.msrb.mxu1 %v1216_v30  ;;  %1223 = vmatmul.f32.vlgmr.msra.gmra.mxu2 %v2026_v45  ;;  %v1008_v45 = vpop.permute.xlu2 %1007 }
 0x1a4   : > { %1340 = vmatpush.msrb.mxu2 %v1241_v39  ;;  %1244 = vmatpush.msra.mxu3 %v1243_v49 }
 0x1a5   : > { %1291 = vmatpush.msrb.mxu0 %v1258_v33  ;;  %1321 = vmatmul.f32.vlgmr.msrb.gmra.mxu1 %v2011_v22 }
 0x1a6   : > { %1344 = vmatpush.msrb.mxu2 %v1247_v38  ;;  %1250 = vmatpush.msra.mxu3 %v1249_v53 }
 0x1a7   : > { %1294 = vmatmul.f32.vlgmr.msrb.gmra.mxu0 %v2000_v40 }
 0x1a8   : > { %1348 = vmatpush.msrb.mxu2 %v1253_v43  ;;  %1256 = vmatpush.msra.mxu3 %v1255_v57 }
 0x1aa   : > { %1352 = vmatpush.msrb.mxu2 %v1259_v47  ;;  %1262 = vmatpush.msra.mxu3 %v1261_v59 }
 0x1ab   : > { %1264 = vmatmul.f32.vlgmr.msra.gmra.mxu3 %v1997_v14  ;;  %1354 = vmatmul.f32.vlgmr.msrb.gmra.mxu2 %v1997_v14 }
 0x1ac   : > { %1371 = vmatpush.msrb.mxu3 %v1210_v32 }
 0x1ae   : > { %1373 = vmatpush.msrb.mxu3 %v1212_v4 }
 0x1b0   : > { %1375 = vmatpush.msrb.mxu3 %v1214_v29 }
 0x1b2   : > { %1377 = vmatpush.msrb.mxu3 %v1216_v30 }
 0x1b3   : > { %1379 = vmatmul.f32.vlgmr.msrb.gmra.mxu3 %v1997_v14 }
 0x1fc   : > { %v1039_v22 = vpop.f32.mrf.mxu0 }
 0x1fd   : > { %v1040_v60 = vadd.f32 %v1039_v22, %v1008_v45 }
 0x204   : > { %v1080_v61 = vpop.f32.mrf.mxu1  ;;  %v1137_v34 = vpop.f32.mrf.mxu3 }
 0x205   : > { %v1081_v40 = vadd.f32 %v1080_v61, %v1040_v60  ;;  %v1170_v1 = vpop.f32.mrf.mxu0 }
 0x206   : > { %v1110_v62 = vpop.f32.mrf.mxu2 }
 0x207   : > { %v1111_v48 = vadd.f32 %v1110_v62, %v1081_v40 }
 0x209   : > { %v1138_v0 = vadd.f32 %v1137_v34, %v1111_v48 }
 0x20b   : > { %v1171_v5 = vadd.f32 %v1170_v1, %v1138_v0 }
 0x20c   : > { %v1195_v35 = vpop.f32.mrf.mxu1 }
 0x20d   : > { %v1196_v36 = vadd.f32 %v1195_v35, %v1171_v5 }
 0x20f   : > { %v1384_v6 = vsel %vm1383_vm1, %v1196_v36, -inf }
 0x210   : > { %v1385_v8 = vrot.slane %v1384_v6, 4 }
 0x212   : > { %v1386_v50 = vmax.f32 %v1384_v6, %v1385_v8 }
 0x214   : > { %v1387_v58 = vrot.slane %v1386_v50, 2 }
 0x216   : > { %v1388_v14 = vmax.f32 %v1386_v50, %v1387_v58 }
 0x218   : > { %v1389_v42 = vrot.slane %v1388_v14, 1 }
 0x21a   : > { %v1390_v56 = vmax.f32 %v1388_v14, %v1389_v42 }
 0x21c   : > { %v1398_v12 = vsub.f32 %v1196_v36, %v1390_v56 }
 0x21e   : > { %v1400_v19 = vmul.f32 1.442695, %v1398_v12 }
 0x220   : > { %1569 = vpow2.f32 %v1400_v19 }
 0x222   : > { %v1322_v13 = vpop.f32.mrf.mxu1 }
 0x224   : > { %v1295_v10 = vpop.f32.mrf.mxu0 }
 0x226   : > { %v1224_v7 = vpop.f32.mrf.mxu2  ;;  %v1570_v63 = vpop.eup %1569 }
 0x227   : > { %v1225_v9 = vadd.f32 %v1224_v7, %v1008_v45  ;;  %v1404_v27 = vsel %vm1383_vm1, %v1570_v63, 0.0 }
 0x228   : > { %v1405_v28 = vrot.slane %v1404_v27, 4 }
 0x22a   : > { %v1406_v30 = vadd.f32 %v1405_v28, %v1404_v27 }
 0x22c   : > { %v1407_v25 = vrot.slane %v1406_v30, 2 }
 0x22e   : > { %v1265_v41 = vpop.f32.mrf.mxu3  ;;  %v1355_v17 = vpop.f32.mrf.mxu2  ;;  %v1408_v32 = vadd.f32 %v1407_v25, %v1406_v30 }
 0x22f   : > { %v1266_v11 = vadd.f32 %v1265_v41, %v1225_v9 }
 0x230   : > { %v1409_v38 = vrot.slane %v1408_v32, 1 }
 0x231   : > { %v1296_v15 = vadd.f32 %v1295_v10, %v1266_v11 }
 0x232   : > { %v1410_v44 = vadd.f32 %v1409_v38, %v1408_v32 }
 0x233   : > { %v1323_v18 = vadd.f32 %v1322_v13, %v1296_v15 }
 0x235   : > { %v1356_v3 = vadd.f32 %v1355_v17, %v1323_v18 }
 0x236   : > { %v1380_v31 = vpop.f32.mrf.mxu3 }
 0x237   : > { %v1381_v2 = vadd.f32 %v1380_v31, %v1356_v3 }
 0x239   : > { %v1391_v51 = vsel %vm1383_vm1, %v1381_v2, -inf }
 0x23a   : > { %v1392_v20 = vrot.slane %v1391_v51, 4 }
 0x23c   : > { %v1393_v54 = vmax.f32 %v1391_v51, %v1392_v20 }
 0x23e   : > { %v1394_v16 = vrot.slane %v1393_v54, 2 }
 0x240   : > { %v1395_v26 = vmax.f32 %v1393_v54, %v1394_v16 }
 0x242   : > { %v1396_v4 = vrot.slane %v1395_v26, 1 }
 0x244   : > { %v1397_v29 = vmax.f32 %v1395_v26, %v1396_v4 }
 0x246   : > { %v1399_v21 = vsub.f32 %v1381_v2, %v1397_v29 }
 0x248   : > { %v1402_v24 = vmul.f32 1.442695, %v1399_v21 }
 0x24a   : > { %1571 = vpow2.f32 %v1402_v24 }
 0x24b   : > { %1573 = vlog2.f32 %v1410_v44 }
 0x250   : > { %v1572_v23 = vpop.eup %1571 }
 0x251   : > { %v1411_v33 = vsel %vm1383_vm1, %v1572_v23, 0.0  ;;  %v1574_v52 = vpop.eup %1573 }
 0x252   : > { %v1412_v37 = vrot.slane %v1411_v33, 4  ;;  %v1419_v55 = vmul.f32 0.6931472, %v1574_v52 }
 0x254   : > { %v1413_v39 = vadd.f32 %v1412_v37, %v1411_v33  ;;  %v1422_v22 = vsub.f32 %v1398_v12, %v1419_v55 }
 0x256   : > { %v1414_v43 = vrot.slane %v1413_v39, 2 }
 0x258   : > { %v1415_v46 = vadd.f32 %v1414_v43, %v1413_v39 }
 0x25a   : > { %v1416_v47 = vrot.slane %v1415_v46, 1 }
 0x25c   : > { %v1417_v49 = vadd.f32 %v1416_v47, %v1415_v46 }
 0x25e   : > { %1575 = vlog2.f32 %v1417_v49 }
 0x264   : > { %v1576_v53 = vpop.eup %1575 }
 0x265   : > { %v1421_v57 = vmul.f32 0.6931472, %v1576_v53 }
 0x267   : > { %v1423_v59 = vsub.f32 %v1399_v21, %v1421_v57 }
 0x269   : > { %v1426_v45 = vrot.slane %v1423_v59, 4 }
 0x26b   : > { %v1427_v60 = vsel %vm1383_vm1, %v1422_v22, %v1426_v45 }
 0x26c   : > { %1429 = vst [vmem:[%s272_s18] sm:$0xff] %v1427_v60 }
 0x26d   : > { %1604 = shalt.err (!%p1601_p3)
}
 0x26e   : > { %1519 = dma.vmem_to_hbm [thread:$0]  (%p1721_p5), %s1445_s19, 128, %s1447_s20, %s1431_s28  }
 0x26f PF: > { %p1525_p4 = scmp.ge.s32.totalorder %s1639_s27, 2  ;;  %s1458_s9 = sand.u32 1, %s1627_s24  }
 0x270   : > { %s1459_s15 = scalar_lea.sflag [#allocation3], %s1458_s9 }
 0x271   : > { %p1522_p7 = pnand %p1525_p4, %p1725_p6 }
 0x273   : > { %p1523_p8 = pneg %p1522_p7 }
 0x275   : > { %1622 = dma.done.wait (%p1523_p8), %s1459_s15, 128  }
 0x276   : > { %1624 = vsyncadd (%p1523_p8), %s1459_s15, 4294967168  ;;  %p17_p9 = scmp.ge.s32.totalorder %s1708_s30, 6   ;;  %s2108_s24 = smov %s1631_s25 }
 0x277   : > { %s2109_s25 = smov %s1635_s26  ;;  %s2110_s26 = smov %s1719_s10 }
 0x278   : > { %s2111_s27 = smov %s1708_s30  ;;  %19 = sbr.rel (!%p17_p9) target bundleno = 3 (0x3), region = 83 }
 0x27d   :  { %1465 = vsyncpa [#allocation3], 1 }
 0x27e   :  { %1467 = vsyncpa [#allocation3 + $0x1], 1 }

</bundles_post_ra>
